<compile_context>
chip_gen: v5e
topology: v5e:2x2
jax: 0.10.0
libtpu: 0.0.40
codegen_flags: <defaults>
</compile_context>

<pallas_src>
import jax
import jax.numpy as jnp
from jax.experimental import pallas as pl
from jax.experimental.pallas import tpu as pltpu

C_IN, H_IN, W_IN = 2, 4, 4
N_FEAT_IN = C_IN * H_IN * W_IN      # 32  (flattened raw input per sample)
N_CONV_OUT = 3 * 3 * 3              # 27  (c_out*9 + oh*3 + ow, PyTorch flatten order)
N_OUT = 5

MAX_BLOCK_ROWS = 8192               # ~2.2 MiB of double-buffered blocks -> fits v5e/v6e/v7x
MIN_GRID_STEPS = 4                  # >=2 steps so v7x's 2nd TC + DMA/compute overlap engage
SMALL_N_FASTPATH = 256              # below this, fused plain-jnp beats kernel launch cost


def _round_up(a, b):
    return ((a + b - 1) // b) * b


def net_kernel(x_ref, m_ref, w_ref, b_ref, o_ref):
    # x_ref: (TB, 32)  raw NCHW-flattened input rows
    # m_ref: (32, 27)  conv folded into a matmul (im2col + flatten order baked in)
    # w_ref: (27, 5)   fc1 weight^T
    # b_ref: (1, 5)    fc1 bias
    # o_ref: (TB, 5)   final output block (single write pass, no padded buffer)
    h = jnp.maximum(
        jnp.dot(x_ref[...], m_ref[...], preferred_element_type=jnp.float32), 0.0)
    y = jnp.dot(h, w_ref[...], preferred_element_type=jnp.float32) + b_ref[...]
    o_ref[...] = jnp.maximum(y, 0.0)


def make_constants():
    """Build all weights ONCE (init / trace time), exactly as in the PyTorch module."""
    conv_w = jnp.array(
        [[[[1.0, 1.0], [2.0, 2.0]], [[1.0, 2.0], [1.0, 2.0]]],
         [[[2.0, 2.0], [1.0, 1.0]], [[2.0, 1.0], [2.0, 1.0]]],
         [[[0.0, 5.0], [0.0, 0.0]], [[0.0, 0.0], [0.0, 10.0]]]],
        dtype=jnp.float32)                                      # (C_out=3, C_in=2, 2, 2)
    fc_w = jnp.stack([jnp.full((N_CONV_OUT,), v, jnp.float32)
                      for v in (2.5, -1.2, 0.5, 3.5, 5.2)])     # (5, 27)
    fc_b = jnp.array([3.0, 4.0, 5.0, 6.0, 7.0], jnp.float32)    # (5,)

    # Fold conv + im2col + NCHW flatten into a single (32, 27) constant matrix:
    # row i is the flattened conv response to the i-th one-hot flat input,
    # so conv(x).flatten() == x.flatten() @ conv_mat  (conv is linear).
    basis = jnp.eye(N_FEAT_IN, dtype=jnp.float32).reshape(N_FEAT_IN, C_IN, H_IN, W_IN)
    conv_mat = jax.lax.conv_general_dilated(
        basis, conv_w, window_strides=(1, 1), padding='VALID',
        dimension_numbers=('NCHW', 'OIHW', 'NCHW')).reshape(N_FEAT_IN, N_CONV_OUT)

    fc_wT = fc_w.T                                  # (27, 5)
    fc_b_row = fc_b.reshape(1, N_OUT)               # (1, 5)
    return conv_mat, fc_wT, fc_b_row, (conv_w, fc_w, fc_b)


def _fused_jnp(x_flat, conv_mat, fc_wT, fc_b_row):
    h = jnp.maximum(x_flat @ conv_mat, 0.0)
    return jnp.maximum(h @ fc_wT + fc_b_row, 0.0)


def network_forward(x, conv_mat, fc_wT, fc_b_row, *, force_pallas=False):
    N = x.shape[0]
    x_flat = x.reshape(N, N_FEAT_IN)                 # contiguous view, no compute

    # Small-batch fast path: fixed pallas_call launch cost dominates at tiny N.
    if not force_pallas and N < SMALL_N_FASTPATH:
        return _fused_jnp(x_flat, conv_mat, fc_wT, fc_b_row)

    # Batch tile: multiple of 8 (sublane rule), capped by VMEM budget, and small
    # enough to give >= MIN_GRID_STEPS grid steps (dual-TC sharding + pipelining).
    if N <= 8:
        tb = N                                       # block equals full dim -> allowed
    else:
        tb = min(MAX_BLOCK_ROWS,
                 _round_up(pl.cdiv(N, MIN_GRID_STEPS), 8),
                 (N // 8) * 8)
    grid = (pl.cdiv(N, tb),)

    cost = pl.CostEstimate(
        flops=2 * N * (N_FEAT_IN * N_CONV_OUT + N_CONV_OUT * N_OUT),
        transcendentals=0,
        bytes_accessed=4 * (N * (N_FEAT_IN + N_OUT)
                            + N_FEAT_IN * N_CONV_OUT
                            + N_CONV_OUT * N_OUT + N_OUT))

    out = pl.pallas_call(
        net_kernel,
        out_shape=jax.ShapeDtypeStruct((N, N_OUT), jnp.float32),
        grid=grid,
        in_specs=[
            pl.BlockSpec((tb, N_FEAT_IN), lambda i: (i, 0)),           # streamed / pipelined
            pl.BlockSpec((N_FEAT_IN, N_CONV_OUT), lambda i: (0, 0)),   # VMEM-resident weight
            pl.BlockSpec((N_CONV_OUT, N_OUT), lambda i: (0, 0)),       # VMEM-resident weight
            pl.BlockSpec((1, N_OUT), lambda i: (0, 0)),                # VMEM-resident bias
        ],
        out_specs=pl.BlockSpec((tb, N_OUT), lambda i: (i, 0)),         # direct (N,5) output
        compiler_params=pltpu.CompilerParams(
            dimension_semantics=("parallel",)),       # shard batch over v7x's 2 TCs
        cost_estimate=cost,
    )(x_flat, conv_mat, fc_wT, fc_b_row)
    return out


def network_reference(x, conv_w, fc_w, fc_b):
    # Pure-JAX reference for correctness checking.
    conv = jax.lax.conv_general_dilated(
        x, conv_w, window_strides=(1, 1), padding='VALID',
        dimension_numbers=('NCHW', 'OIHW', 'NCHW'))
    h = jnp.maximum(conv, 0.0).reshape(x.shape[0], -1)
    y = h @ fc_w.T + fc_b
    return jnp.maximum(y, 0.0)


if __name__ == "__main__":
    conv_mat, fc_wT, fc_b_row, (conv_w, fc_w, fc_b) = make_constants()

    key = jax.random.PRNGKey(0)
    k0, k1 = jax.random.split(key)
    # fc1 expects 3*3*3 features => conv output spatial is 3x3 => input is (N, 2, 4, 4)
    x = jax.random.normal(k0, (2, C_IN, H_IN, W_IN), dtype=jnp.float32)

    fwd = jax.jit(network_forward, static_argnames=("force_pallas",))

    # 1) Pallas path, tiny batch (single grid step).
    out = jax.block_until_ready(fwd(x, conv_mat, fc_wT, fc_b_row, force_pallas=True))
    ref = network_reference(x, conv_w, fc_w, fc_b)
    assert out.shape == (2, N_OUT)
    assert jnp.allclose(out, ref, atol=1e-4, rtol=1e-4), (out, ref)

    # 2) Pallas path, multi-step grid (exercises pipelining / dual-TC sharding).
    x2 = jax.random.normal(k1, (24, C_IN, H_IN, W_IN), dtype=jnp.float32)
    out2 = jax.block_until_ready(fwd(x2, conv_mat, fc_wT, fc_b_row, force_pallas=True))
    ref2 = network_reference(x2, conv_w, fc_w, fc_b)
    assert jnp.allclose(out2, ref2, atol=1e-4, rtol=1e-4)

    # 3) Small-N fused-jnp fast path consistency (auto dispatch).
    out3 = jax.block_until_ready(fwd(x, conv_mat, fc_wT, fc_b_row))
    assert jnp.allclose(out3, ref, atol=1e-4, rtol=1e-4)

    print("KERNEL_OK")
</pallas_src>

<mosaic_0001>
module attributes {stable_mosaic.version = 11 : i64} {
  func.func @net_kernel(%arg0: i32, %arg1: memref<2x32xf32, #tpu.memory_space<vmem>>, %arg2: memref<32x27xf32, #tpu.memory_space<vmem>>, %arg3: memref<27x5xf32, #tpu.memory_space<vmem>>, %arg4: memref<1x5xf32, #tpu.memory_space<vmem>>, %arg5: memref<2x5xf32, #tpu.memory_space<vmem>>) attributes {dimension_semantics = [#tpu.dimension_semantics<parallel>], iteration_bounds = array<i64: 1>, scalar_prefetch = 0 : i64, scratch_operands = 0 : i64, tpu.core_type = #tpu.core_type<tc>, window_params = [{transform_indices = @transform_0, window_bounds = array<i64: 2, 32>}, {pipeline_mode = #tpu.pipeline_mode<synchronous>, transform_indices = @transform_1, window_bounds = array<i64: 32, 27>}, {pipeline_mode = #tpu.pipeline_mode<synchronous>, transform_indices = @transform_2, window_bounds = array<i64: 27, 5>}, {pipeline_mode = #tpu.pipeline_mode<synchronous>, transform_indices = @transform_3, window_bounds = array<i64: 1, 5>}, {transform_indices = @transform_4, window_bounds = array<i64: 2, 5>}]} {
    %c0 = arith.constant 0 : index
    %c0_0 = arith.constant 0 : index
    %0 = vector.load %arg1[%c0, %c0_0] : memref<2x32xf32, #tpu.memory_space<vmem>>, vector<2x32xf32>
    %c0_1 = arith.constant 0 : index
    %c0_2 = arith.constant 0 : index
    %1 = vector.load %arg2[%c0_1, %c0_2] : memref<32x27xf32, #tpu.memory_space<vmem>>, vector<32x27xf32>
    %cst = arith.constant dense<0.000000e+00> : vector<2x27xf32>
    %2 = tpu.matmul %0, %1, %cst {dimension_numbers = #tpu.dot_dimension_numbers<[1], [0], [0], [1], [0, 0, 1, 1], [], []>} : vector<2x32xf32>, vector<32x27xf32>, vector<2x27xf32> -> vector<2x27xf32>
    %cst_3 = arith.constant 0.000000e+00 : f32
    %3 = vector.broadcast %cst_3 : f32 to vector<2x27xf32>
    %4 = arith.maximumf %2, %3 : vector<2x27xf32>
    %c0_4 = arith.constant 0 : index
    %c0_5 = arith.constant 0 : index
    %5 = vector.load %arg3[%c0_4, %c0_5] : memref<27x5xf32, #tpu.memory_space<vmem>>, vector<27x5xf32>
    %cst_6 = arith.constant dense<0.000000e+00> : vector<2x5xf32>
    %6 = tpu.matmul %4, %5, %cst_6 {dimension_numbers = #tpu.dot_dimension_numbers<[1], [0], [0], [1], [0, 0, 1, 1], [], []>} : vector<2x27xf32>, vector<27x5xf32>, vector<2x5xf32> -> vector<2x5xf32>
    %c0_7 = arith.constant 0 : index
    %c0_8 = arith.constant 0 : index
    %7 = vector.load %arg4[%c0_7, %c0_8] : memref<1x5xf32, #tpu.memory_space<vmem>>, vector<1x5xf32>
    %8 = vector.broadcast %7 : vector<1x5xf32> to vector<2x5xf32>
    %9 = arith.addf %6, %8 : vector<2x5xf32>
    %cst_9 = arith.constant 0.000000e+00 : f32
    %10 = vector.broadcast %cst_9 : f32 to vector<2x5xf32>
    %11 = arith.maximumf %9, %10 : vector<2x5xf32>
    %c0_10 = arith.constant 0 : index
    %c0_11 = arith.constant 0 : index
    %12 = vector.load %arg5[%c0_10, %c0_11] : memref<2x5xf32, #tpu.memory_space<vmem>>, vector<2x5xf32>
    tpu.vector_store %arg5[%c0_10, %c0_11], %11 {strides = array<i32>} : memref<2x5xf32, #tpu.memory_space<vmem>>, vector<2x5xf32>,
    return
  }
  func.func @transform_0(%arg0: i32) -> (i32, i32) {
    %c0_i32 = arith.constant 0 : i32
    %c0_i32_0 = arith.constant 0 : i32
    return %arg0, %c0_i32 : i32, i32
  }
  func.func @transform_1(%arg0: i32) -> (i32, i32) {
    %c0_i32 = arith.constant 0 : i32
    %c0_i32_0 = arith.constant 0 : i32
    %c0_i32_1 = arith.constant 0 : i32
    return %c0_i32, %c0_i32_0 : i32, i32
  }
  func.func @transform_2(%arg0: i32) -> (i32, i32) {
    %c0_i32 = arith.constant 0 : i32
    %c0_i32_0 = arith.constant 0 : i32
    %c0_i32_1 = arith.constant 0 : i32
    return %c0_i32, %c0_i32_0 : i32, i32
  }
  func.func @transform_3(%arg0: i32) -> (i32, i32) {
    %c0_i32 = arith.constant 0 : i32
    %c0_i32_0 = arith.constant 0 : i32
    %c0_i32_1 = arith.constant 0 : i32
    return %c0_i32, %c0_i32_0 : i32, i32
  }
  func.func @transform_4(%arg0: i32) -> (i32, i32) {
    %c0_i32 = arith.constant 0 : i32
    %c0_i32_0 = arith.constant 0 : i32
    return %arg0, %c0_i32 : i32, i32
  }
}

</mosaic_0001>

<bundles_post_ra>
// kernel: network_forward.1
= control target key start
LH: loop header
LB: loop body
LE: loop exit
PB: predicated region body
PF: predicated region fallthrough
CT: control target
= control target key end

     0   :  { %vm60_vm0 = vcmask 1042432   ;;  %s193_s0 = inlined_call_operand.vmem [shape: f32[2,32], index: 0, kind: input, shape index: {}]   ;;  %s194_s1 = inlined_call_operand.vmem [shape: f32[32,27], index: 1, kind: input, shape index: {}]   ;;  %s195_s2 = inlined_call_operand.vmem [shape: f32[27,5], index: 2, kind: input, shape index: {}]   ;;  %s196_s3 = inlined_call_operand.vmem [shape: f32[1,5], index: 3, kind: input, shape index: {}]   ;;  %s197_s4 = inlined_call_operand.hbm [shape: f32[2,5], index: 4, kind: output, shape index: {}]  }
   0x1   :  { %v22_v0 = vld [vmem:[%s194_s1 + $0x18] sm:$0xff]  ;;  %v21_v1 = vld [vmem:[%s194_s1 + $0x10] sm:$0xff]  ;;  %v20_v2 = vld [vmem:[%s194_s1 + $0x8] sm:$0xff] }
   0x2   :  { %39 = vmatpush.msra.mxu0 %v22_v0  ;;  %v51_v3 = vld [vmem:[%s195_s2 + $0x18] sm:$0x7]  ;;  %v50_v4 = vld [vmem:[%s195_s2 + $0x10] sm:$0xff] }
   0x3   :  { %104 = vmatpush.msk.msra.mxu1 %vm60_vm0, %v51_v3 }
   0x4   :  { %9 = vsyncpa [#allocation3], 0  ;;  %40 = vmatpush.msra.mxu0 %v21_v1  ;;  %v19_v5 = vld [vmem:[%s194_s1] sm:$0xff]  ;;  %vm23_vm1 = vcmask 261120   ;;  %v49_v7 = vld [vmem:[%s195_s2 + $0x8] sm:$0xff]  ;;  %vm56_vm2 = vcmask 220160  }
   0x5   :  { %77 = vmatpush.msra.mxu1 %v50_v4  ;;  %v18_v6 = vld [vmem:[%s193_s0] sm:$0x3]  ;;  %s134_s0 = smov [#allocation2]   ;;  %s94_s11 = sshll.u32 %s197_s4, 4  ;;  %vm85_vm3 = vcmask 33792   ;;  %s95_s11 = int_to_ptr.hbm [resolvable:$true] %s94_s11 }
   0x6   :  { %41 = vmatpush.msra.mxu0 %v20_v2  ;;  %v48_v8 = vld [vmem:[%s195_s2] sm:$0xff]  ;;  %s92_s8 = sshll.u32 %s134_s0, 4  ;;  %s93_s8 = int_to_ptr.vmem [resolvable:$true] %s92_s8 }
   0x7   :  { %78 = vmatpush.msra.mxu1 %v49_v7  ;;  %v107_v11 = vld [vmem:[%s196_s3] ss:$0 sm:$0xff] }
   0x8   :  { %42 = vmatpush.msra.mxu0 %v19_v5 }
   0x9   :  { %103 = vmatmul.msk.f32.vlgmr.msra.gmra.mxu0 %vm23_vm1, %v18_v6  ;;  %79 = vmatpush.msra.mxu1 %v48_v8 }
  0x86   :  { %v44_v9 = vpop.f32.mrf.mxu0 }
  0x87   :  { %v47_v10 = vmax.f32 %v44_v9, 0.0 }
  0x89   :  { %105 = vmatmul.msk.f32.vlgmr.msra.gmra.mxu1 %vm56_vm2, %v47_v10 }
 0x106   :  { %v81_v12 = vpop.f32.mrf.mxu1 }
 0x107   :  { %v82_v13 = vadd.f32 %v107_v11, %v81_v12 }
 0x109   :  { %v84_v14 = vmax.f32 %v82_v13, 0.0 }
 0x10b   :  { %86 = vst.msk [vmem:[#allocation2] sm:$0x3] %vm85_vm3, %v84_v14 }
 0x10c   :  { %97 = dma.vmem_to_hbm [thread:$0]  %s93_s8, 32, %s95_s11, [#allocation3]  }
 0x10d   :  { %132 = dma.done.wait [#allocation3], 32  }
 0x10e   :  { %133 = vsyncadd [#allocation3], 4294967264 }
 0x10f   :  { %102 = vsyncpa [#allocation3], 1 }

</bundles_post_ra>
